<compile_context>
chip_gen: v6e
topology: v6e:2x2x1
jax: 0.10.0
libtpu: 0.0.40
codegen_flags: <defaults>
</compile_context>

<pallas_src>
import functools

import jax
import jax.numpy as jnp
from jax.experimental import pallas as pl
from jax.experimental.pallas import tpu as pltpu


# ----------------------------- kernel 1 --------------------------------------
# Per sample: channel attention gate + channel-wise stats + 7x7 conv (pre-BN).

def _channel_att_conv_kernel(x_ref, w1_ref, b1_ref, w2_ref, b2_ref, bmat_ref,
                             scale_ref, conv_ref, lhs_scr, *, H, W):
    # x_ref:     (1, C, H, W)        one sample (original NCHW layout)
    # w1_ref:    (8, C)              Linear(C, 8).weight
    # b1_ref:    (8, 1)
    # w2_ref:    (C, 8)              Linear(8, C).weight
    # b2_ref:    (C, 1)
    # bmat_ref:  (7*2*W, W)          fused banded conv matrix (from 7x7 weight)
    # scale_ref: (1, C, 1)    out    per-channel sigmoid gate
    # conv_ref:  (1, H, W)    out    pre-BN spatial-conv output
    # lhs_scr:   (H, 7*2*W)          VMEM scratch: fused conv LHS
    x = x_ref[0].astype(jnp.float32)                      # (C, H, W)

    # ---- channel attention: per-channel mean & max over (H, W) ----
    avg = jnp.mean(jnp.mean(x, axis=1), axis=1, keepdims=True)   # (C, 1)
    mx = jnp.max(jnp.max(x, axis=1), axis=1, keepdims=True)      # (C, 1)
    v = jnp.concatenate([avg, mx], axis=1)                # (C, 2) both pooled vecs
    # Tiny MLP matmuls (K=8, 2 result columns): latency-only on the MXU.
    h = jnp.dot(w1_ref[...], v, preferred_element_type=jnp.float32) + b1_ref[...]
    h = jnp.where(h > 0, h, 0.01 * h)                     # LeakyReLU(0.01)
    logits = jnp.dot(w2_ref[...], h,
                     preferred_element_type=jnp.float32) + b2_ref[...]   # (C, 2)
    scale = jax.nn.sigmoid(logits[:, 0:1] + logits[:, 1:2])              # (C, 1)
    scale_ref[...] = scale[None]                          # (1, C, 1)

    y = x * scale[:, :, None]                             # (C, H, W) gated

    # ---- channel-wise mean / max, directly in (H, W) layout ----
    ch_mean = jnp.mean(y, axis=0)                         # (H, W)
    ch_max = jnp.max(y, axis=0)                           # (H, W)

    # ---- fused conv LHS: 7 row-shifted copies of [mean | max] ----
    # Re-zero only the 3-row halo bands; every other element is overwritten
    # below each step, so no cross-step scratch persistence is assumed
    # (megacore-safe with "parallel" batch semantics).
    KW = lhs_scr.shape[1]
    lhs_scr[0:3, :] = jnp.zeros((3, KW), jnp.float32)
    lhs_scr[H - 3:H, :] = jnp.zeros((3, KW), jnp.float32)
    for ki in range(7):                                   # static unroll (7 taps)
        lo, hi = max(0, 3 - ki), min(H, H + 3 - ki)       # rows of the LHS block
        slo, shi = lo + ki - 3, hi + ki - 3               # rows of the stat map
        col = ki * 2 * W
        lhs_scr[lo:hi, col:col + W] = ch_mean[slo:shi, :]
        lhs_scr[lo:hi, col + W:col + 2 * W] = ch_max[slo:shi, :]

    # ---- 7x7 conv (2 -> 1 channels) as ONE MXU matmul, K = 14*W ----
    conv_ref[...] = jnp.dot(lhs_scr[...], bmat_ref[...],
                            preferred_element_type=jnp.float32)[None]   # (1, H, W)


# ----------------------------- kernel 2 --------------------------------------
# Per (sample, channel-tile): out = x * channel_gate * sigmoid(a*conv + b)

def _apply_attention_kernel(x_ref, scale_ref, conv_ref, ab_ref, out_ref):
    # x_ref:     (1, tc, HW)   lane-dense (HW last)
    # scale_ref: (1, tc, 1)    channel gate from kernel 1
    # conv_ref:  (1, 1, HW)    pre-BN conv output (flat, f32)
    # ab_ref:    (1, 2)        BatchNorm folded to affine: norm = a*conv + b
    # out_ref:   (1, tc, HW)
    a = ab_ref[:, 0:1][:, :, None]                        # (1, 1, 1)
    b = ab_ref[:, 1:2][:, :, None]                        # (1, 1, 1)
    att = jax.nn.sigmoid(conv_ref[...] * a + b)           # (1, 1, HW)
    y = x_ref[...].astype(jnp.float32) * scale_ref[...] * att
    out_ref[...] = y.astype(out_ref.dtype)                # lane-dense store


# ----------------------------- wrapper ---------------------------------------


def _fused_conv_matrix(wconv, W):
    """RHS B (7*2*W, W) for the fused conv matmul.

    conv[h, w] = sum_{ki,stat,c} LHS[h, ki*2W + stat*W + c] * B[ki*2W+stat*W+c, w]
    with LHS[h, ki*2W + stat*W + c] = stat_map[stat, h + ki - 3, c] (0 outside).
    """
    c = jnp.arange(W)[:, None]                 # stat-map column
    w = jnp.arange(W)[None, :]                 # output column
    kj = c - w + 3                             # column tap offset
    valid = (kj >= 0) & (kj < 7)
    taps = wconv[0][:, :, jnp.clip(kj, 0, 6)]  # (2, 7, W, W): [stat, ki, c, w]
    band = jnp.where(valid[None, None], taps.astype(jnp.float32), 0.0)
    return jnp.transpose(band, (1, 0, 2, 3)).reshape(7 * 2 * W, W)


def cbam_pallas(x, w1, b1, w2, b2, wconv, gamma, beta):
    N, C, H, W = x.shape
    HW = H * W
    Hd = w1.shape[0]                           # MLP hidden size (8)
    KW = 7 * 2 * W                             # fused conv contraction length

    bmat = _fused_conv_matrix(wconv, W)        # (14*W, W)

    cparams1 = pltpu.CompilerParams(
        dimension_semantics=("parallel",),     # megacore over the batch dim
        vmem_limit_bytes=32 * 1024 * 1024,     # safe on v5e/v6e/v7x
    )

    kernel1 = functools.partial(_channel_att_conv_kernel, H=H, W=W)
    # TODO(synk): add a C (and/or HW) "arbitrary" reduction axis with VMEM
    # accumulators in kernel 1 if C*H*W ever exceeds the per-block VMEM budget.
    scale, conv_hw = pl.pallas_call(
        kernel1,
        grid=(N,),
        out_shape=(
            jax.ShapeDtypeStruct((N, C, 1), jnp.float32),   # channel gate
            jax.ShapeDtypeStruct((N, H, W), jnp.float32),   # pre-BN conv map
        ),
        in_specs=[
            pl.BlockSpec((1, C, H, W), lambda n: (n, 0, 0, 0)),   # x (per sample)
            pl.BlockSpec((Hd, C), lambda n: (0, 0)),              # W1
            pl.BlockSpec((Hd, 1), lambda n: (0, 0)),              # b1
            pl.BlockSpec((C, Hd), lambda n: (0, 0)),              # W2
            pl.BlockSpec((C, 1), lambda n: (0, 0)),               # b2
            pl.BlockSpec((KW, W), lambda n: (0, 0)),              # fused conv RHS
        ],
        out_specs=(
            pl.BlockSpec((1, C, 1), lambda n: (n, 0, 0)),
            pl.BlockSpec((1, H, W), lambda n: (n, 0, 0)),
        ),
        scratch_shapes=[pltpu.VMEM((H, KW), jnp.float32)],
        compiler_params=cparams1,
    )(x, w1.astype(jnp.float32), b1.reshape(-1, 1).astype(jnp.float32),
      w2.astype(jnp.float32), b2.reshape(-1, 1).astype(jnp.float32), bmat)

    # BatchNorm2d(1) training-mode batch statistics: a reduction across ALL
    # samples (i.e. across the grid), computed here from the tiny (N,H,W) conv
    # map and folded into one affine (a, b) that kernel 2 applies element-wise.
    conv_flat = conv_hw.reshape(N, 1, HW)      # row-major: layout no-op
    m = jnp.mean(conv_flat)
    var = jnp.mean((conv_flat - m) ** 2)       # biased, like torch BN (train)
    a = gamma * jax.lax.rsqrt(var + 1e-5)
    b = beta - m * a
    ab = jnp.stack([a, b]).reshape(1, 2).astype(jnp.float32)

    # Kernel 2: lane-dense (HW last) blocks, channel-tiled for megacore balance
    # and smaller VMEM working set (important on v7x's 64 MiB VMEM).
    tc = 128 if (C % 128 == 0 and C > 128) else C
    x3 = x.reshape(N, C, HW)                   # bitcast view: no copy, no cast
    cparams2 = pltpu.CompilerParams(
        dimension_semantics=("parallel", "parallel"),
        vmem_limit_bytes=32 * 1024 * 1024,
    )
    # NOTE: input_output_aliases={0: 0} is intentionally omitted — x is a live,
    # non-donated jit argument, so XLA would insert a defensive full-tensor copy.
    # TODO(synk): consider pipeline_mode=pl.Buffered(3) on the x spec to amortize
    # the ~0.35us/step overhead on v6e once block sizing is finalized.
    out3 = pl.pallas_call(
        _apply_attention_kernel,
        grid=(N, C // tc),
        out_shape=jax.ShapeDtypeStruct((N, C, HW), x.dtype),
        in_specs=[
            pl.BlockSpec((1, tc, HW), lambda n, c: (n, c, 0)),
            pl.BlockSpec((1, tc, 1), lambda n, c: (n, c, 0)),
            pl.BlockSpec((1, 1, HW), lambda n, c: (n, 0, 0)),
            pl.BlockSpec((1, 2), lambda n, c: (0, 0)),
        ],
        out_specs=pl.BlockSpec((1, tc, HW), lambda n, c: (n, c, 0)),
        compiler_params=cparams2,
    )(x3, scale, conv_flat, ab)
    return out3.reshape(N, C, H, W)


# ----------------------------- reference (pure JAX) ---------------------------


def cbam_ref(x, w1, b1, w2, b2, wconv, gamma, beta):
    hp = jax.lax.Precision.HIGHEST
    avg = x.mean(axis=(2, 3))
    mx = x.max(axis=(2, 3))

    def mlp(v):
        h = jnp.dot(v, w1.T, precision=hp) + b1
        h = jnp.where(h > 0, h, 0.01 * h)
        return jnp.dot(h, w2.T, precision=hp) + b2

    s = jax.nn.sigmoid(mlp(avg) + mlp(mx))
    y = x * s[:, :, None, None]

    ca = y.mean(axis=1, keepdims=True)
    cm = y.max(axis=1, keepdims=True)
    st = jnp.concatenate([ca, cm], axis=1)
    conv = jax.lax.conv_general_dilated(
        st, wconv, window_strides=(1, 1), padding=[(3, 3), (3, 3)],
        dimension_numbers=("NCHW", "OIHW", "NCHW"), precision=hp)
    m = conv.mean()
    v = jnp.mean((conv - m) ** 2)
    norm = (conv - m) * jax.lax.rsqrt(v + 1e-5) * gamma + beta
    att = jax.nn.sigmoid(norm)
    return y * att


# ----------------------------- main -------------------------------------------


if __name__ == "__main__":
    N, C, H, W = 2, 4, 16, 16
    HIDDEN = 8  # hard-coded in the reference ChannelAttention MLP

    key = jax.random.PRNGKey(0)
    kx, k1, k2, k3, k4, k5 = jax.random.split(key, 6)

    x = jax.random.normal(kx, (N, C, H, W), jnp.float32)

    # Deterministic synthetic parameters (shapes from the module's __init__).
    w1 = 0.1 * jax.random.normal(k1, (HIDDEN, C), jnp.float32)    # Linear(C, 8).weight
    b1 = 0.1 * jax.random.normal(k2, (HIDDEN,), jnp.float32)
    w2 = 0.1 * jax.random.normal(k3, (C, HIDDEN), jnp.float32)    # Linear(8, C).weight
    b2 = 0.1 * jax.random.normal(k4, (C,), jnp.float32)
    wconv = 0.1 * jax.random.normal(k5, (1, 2, 7, 7), jnp.float32)  # Conv2d(2,1,7), no bias
    gamma, beta = 1.0, 0.0                                           # BatchNorm2d(1) defaults

    out = jax.jit(cbam_pallas)(x, w1, b1, w2, b2, wconv, gamma, beta)
    out = jax.block_until_ready(out)

    ref = cbam_ref(x, w1, b1, w2, b2, wconv, gamma, beta)
    assert out.shape == (N, C, H, W)
    # Tolerance covers MXU vs. XLA-HIGHEST matmul/conv precision differences;
    # any semantic bug (padding offset, BN stats, transposes) is far larger.
    assert bool(jnp.allclose(out, ref, rtol=5e-3, atol=1e-3)), "mismatch vs reference"

    print("KERNEL_OK")
</pallas_src>

<mosaic_0001>
module attributes {stable_mosaic.version = 11 : i64} {
  func.func @_channel_att_conv_kernel(%arg0: i32, %arg1: memref<1x4x16x16xf32, #tpu.memory_space<vmem>>, %arg2: memref<8x4xf32, #tpu.memory_space<vmem>>, %arg3: memref<8x1xf32, #tpu.memory_space<vmem>>, %arg4: memref<4x8xf32, #tpu.memory_space<vmem>>, %arg5: memref<4x1xf32, #tpu.memory_space<vmem>>, %arg6: memref<224x16xf32, #tpu.memory_space<vmem>>, %arg7: memref<1x4x1xf32, #tpu.memory_space<vmem>>, %arg8: memref<1x16x16xf32, #tpu.memory_space<vmem>>, %arg9: memref<16x224xf32, #tpu.memory_space<vmem>>) attributes {dimension_semantics = [#tpu.dimension_semantics<parallel>], iteration_bounds = array<i64: 2>, scalar_prefetch = 0 : i64, scratch_operands = 1 : i64, tpu.core_type = #tpu.core_type<tc>, window_params = [{transform_indices = @transform_0, window_bounds = array<i64: 1, 4, 16, 16>}, {pipeline_mode = #tpu.pipeline_mode<synchronous>, transform_indices = @transform_1, window_bounds = array<i64: 8, 4>}, {pipeline_mode = #tpu.pipeline_mode<synchronous>, transform_indices = @transform_2, window_bounds = array<i64: 8, 1>}, {pipeline_mode = #tpu.pipeline_mode<synchronous>, transform_indices = @transform_3, window_bounds = array<i64: 4, 8>}, {pipeline_mode = #tpu.pipeline_mode<synchronous>, transform_indices = @transform_4, window_bounds = array<i64: 4, 1>}, {pipeline_mode = #tpu.pipeline_mode<synchronous>, transform_indices = @transform_5, window_bounds = array<i64: 224, 16>}, {transform_indices = @transform_6, window_bounds = array<i64: 1, 4, 1>}, {transform_indices = @transform_7, window_bounds = array<i64: 1, 16, 16>}]} {
    %c0 = arith.constant 0 : index
    %c0_0 = arith.constant 0 : index
    %c0_1 = arith.constant 0 : index
    %c0_2 = arith.constant 0 : index
    %0 = vector.load %arg1[%c0, %c0_0, %c0_1, %c0_2] : memref<1x4x16x16xf32, #tpu.memory_space<vmem>>, vector<1x4x16x16xf32>
    %1 = vector.shape_cast %0 : vector<1x4x16x16xf32> to vector<4x16x16xf32>
    %cst = arith.constant dense<0.000000e+00> : vector<4x16xf32>
    %2 = vector.multi_reduction <add>, %1, %cst [1] : vector<4x16x16xf32> to vector<4x16xf32>
    %cst_3 = arith.constant 1.600000e+01 : f32
    %3 = vector.broadcast %cst_3 : f32 to vector<4x16xf32>
    %4 = arith.divf %2, %3 : vector<4x16xf32>
    %cst_4 = arith.constant dense<0.000000e+00> : vector<4xf32>
    %5 = vector.multi_reduction <add>, %4, %cst_4 [1] : vector<4x16xf32> to vector<4xf32>
    %6 = vector.shape_cast %5 : vector<4xf32> to vector<4x1xf32>
    %cst_5 = arith.constant 1.600000e+01 : f32
    %7 = vector.broadcast %cst_5 : f32 to vector<4x1xf32>
    %8 = arith.divf %6, %7 : vector<4x1xf32>
    %cst_6 = arith.constant dense<0xFF800000> : vector<4x16xf32>
    %9 = vector.multi_reduction <maximumf>, %1, %cst_6 [1] : vector<4x16x16xf32> to vector<4x16xf32>
    %cst_7 = arith.constant dense<0xFF800000> : vector<4xf32>
    %10 = vector.multi_reduction <maximumf>, %9, %cst_7 [1] : vector<4x16xf32> to vector<4xf32>
    %11 = vector.shape_cast %10 : vector<4xf32> to vector<4x1xf32>
    %12 = tpu.concatenate %8, %11 in 1 : vector<4x1xf32>, vector<4x1xf32> -> vector<4x2xf32>
    %c0_8 = arith.constant 0 : index
    %c0_9 = arith.constant 0 : index
    %13 = vector.load %arg2[%c0_8, %c0_9] : memref<8x4xf32, #tpu.memory_space<vmem>>, vector<8x4xf32>
    %cst_10 = arith.constant dense<0.000000e+00> : vector<8x2xf32>
    %14 = tpu.matmul %13, %12, %cst_10 {dimension_numbers = #tpu.dot_dimension_numbers<[1], [0], [0], [1], [0, 0, 1, 1], [], []>} : vector<8x4xf32>, vector<4x2xf32>, vector<8x2xf32> -> vector<8x2xf32>
    %c0_11 = arith.constant 0 : index
    %c0_12 = arith.constant 0 : index
    %15 = vector.load %arg3[%c0_11, %c0_12] : memref<8x1xf32, #tpu.memory_space<vmem>>, vector<8x1xf32>
    %16 = vector.broadcast %15 : vector<8x1xf32> to vector<8x2xf32>
    %17 = arith.addf %14, %16 : vector<8x2xf32>
    %cst_13 = arith.constant 0.000000e+00 : f32
    %18 = vector.broadcast %cst_13 : f32 to vector<8x2xf32>
    %19 = arith.cmpf ogt, %17, %18 : vector<8x2xf32>
    %cst_14 = arith.constant 0.00999999977 : f32
    %20 = vector.broadcast %cst_14 : f32 to vector<8x2xf32>
    %21 = arith.mulf %20, %17 : vector<8x2xf32>
    %22 = arith.select %19, %17, %21 : vector<8x2xi1>, vector<8x2xf32>
    %c0_15 = arith.constant 0 : index
    %c0_16 = arith.constant 0 : index
    %23 = vector.load %arg4[%c0_15, %c0_16] : memref<4x8xf32, #tpu.memory_space<vmem>>, vector<4x8xf32>
    %cst_17 = arith.constant dense<0.000000e+00> : vector<4x2xf32>
    %24 = tpu.matmul %23, %22, %cst_17 {dimension_numbers = #tpu.dot_dimension_numbers<[1], [0], [0], [1], [0, 0, 1, 1], [], []>} : vector<4x8xf32>, vector<8x2xf32>, vector<4x2xf32> -> vector<4x2xf32>
    %c0_18 = arith.constant 0 : index
    %c0_19 = arith.constant 0 : index
    %25 = vector.load %arg5[%c0_18, %c0_19] : memref<4x1xf32, #tpu.memory_space<vmem>>, vector<4x1xf32>
    %26 = vector.broadcast %25 : vector<4x1xf32> to vector<4x2xf32>
    %27 = arith.addf %24, %26 : vector<4x2xf32>
    %28 = vector.extract_strided_slice %27 {offsets = [0, 0], sizes = [4, 1], strides = [1, 1]} : vector<4x2xf32> to vector<4x1xf32>
    %29 = vector.extract_strided_slice %27 {offsets = [0, 1], sizes = [4, 1], strides = [1, 1]} : vector<4x2xf32> to vector<4x1xf32>
    %30 = arith.addf %28, %29 : vector<4x1xf32>
    %31 = arith.negf %30 : vector<4x1xf32>
    %32 = math.exp %31 : vector<4x1xf32>
    %cst_20 = arith.constant 1.000000e+00 : f32
    %33 = vector.broadcast %cst_20 : f32 to vector<4x1xf32>
    %34 = arith.addf %33, %32 : vector<4x1xf32>
    %35 = arith.divf %33, %34 : vector<4x1xf32>
    %36 = vector.shape_cast %35 : vector<4x1xf32> to vector<1x4x1xf32>
    %c0_21 = arith.constant 0 : index
    %c0_22 = arith.constant 0 : index
    %c0_23 = arith.constant 0 : index
    %37 = vector.load %arg7[%c0_21, %c0_22, %c0_23] : memref<1x4x1xf32, #tpu.memory_space<vmem>>, vector<1x4x1xf32>
    tpu.vector_store %arg7[%c0_21, %c0_22, %c0_23], %36 {strides = array<i32>} : memref<1x4x1xf32, #tpu.memory_space<vmem>>, vector<1x4x1xf32>,
    %38 = vector.shape_cast %35 : vector<4x1xf32> to vector<4x1x1xf32>
    %39 = vector.broadcast %38 : vector<4x1x1xf32> to vector<4x16x16xf32>
    %40 = arith.mulf %1, %39 : vector<4x16x16xf32>
    %cst_24 = arith.constant dense<0.000000e+00> : vector<16x16xf32>
    %41 = vector.multi_reduction <add>, %40, %cst_24 [0] : vector<4x16x16xf32> to vector<16x16xf32>
    %cst_25 = arith.constant 4.000000e+00 : f32
    %42 = vector.broadcast %cst_25 : f32 to vector<16x16xf32>
    %43 = arith.divf %41, %42 : vector<16x16xf32>
    %cst_26 = arith.constant dense<0xFF800000> : vector<16x16xf32>
    %44 = vector.multi_reduction <maximumf>, %40, %cst_26 [0] : vector<4x16x16xf32> to vector<16x16xf32>
    %cst_27 = arith.constant 0.000000e+00 : f32
    %45 = vector.broadcast %cst_27 : f32 to vector<3x224xf32>
    %c0_28 = arith.constant 0 : index
    %c0_29 = arith.constant 0 : index
    %46 = vector.load %arg9[%c0_28, %c0_29] : memref<16x224xf32, #tpu.memory_space<vmem>>, vector<3x224xf32>
    tpu.vector_store %arg9[%c0_28, %c0_29], %45 {strides = array<i32>} : memref<16x224xf32, #tpu.memory_space<vmem>>, vector<3x224xf32>,
    %cst_30 = arith.constant 0.000000e+00 : f32
    %47 = vector.broadcast %cst_30 : f32 to vector<3x224xf32>
    %c13 = arith.constant 13 : index
    %c0_31 = arith.constant 0 : index
    %48 = vector.load %arg9[%c13, %c0_31] : memref<16x224xf32, #tpu.memory_space<vmem>>, vector<3x224xf32>
    tpu.vector_store %arg9[%c13, %c0_31], %47 {strides = array<i32>} : memref<16x224xf32, #tpu.memory_space<vmem>>, vector<3x224xf32>,
    %49 = vector.extract_strided_slice %43 {offsets = [0, 0], sizes = [13, 16], strides = [1, 1]} : vector<16x16xf32> to vector<13x16xf32>
    %c3 = arith.constant 3 : index
    %c0_32 = arith.constant 0 : index
    %50 = vector.load %arg9[%c3, %c0_32] : memref<16x224xf32, #tpu.memory_space<vmem>>, vector<13x16xf32>
    tpu.vector_store %arg9[%c3, %c0_32], %49 {strides = array<i32>} : memref<16x224xf32, #tpu.memory_space<vmem>>, vector<13x16xf32>,
    %51 = vector.extract_strided_slice %44 {offsets = [0, 0], sizes = [13, 16], strides = [1, 1]} : vector<16x16xf32> to vector<13x16xf32>
    %c3_33 = arith.constant 3 : index
    %c16 = arith.constant 16 : index
    %52 = vector.load %arg9[%c3_33, %c16] : memref<16x224xf32, #tpu.memory_space<vmem>>, vector<13x16xf32>
    tpu.vector_store %arg9[%c3_33, %c16], %51 {strides = array<i32>} : memref<16x224xf32, #tpu.memory_space<vmem>>, vector<13x16xf32>,
    %53 = vector.extract_strided_slice %43 {offsets = [0, 0], sizes = [14, 16], strides = [1, 1]} : vector<16x16xf32> to vector<14x16xf32>
    %c2 = arith.constant 2 : index
    %c32 = arith.constant 32 : index
    %54 = vector.load %arg9[%c2, %c32] : memref<16x224xf32, #tpu.memory_space<vmem>>, vector<14x16xf32>
    tpu.vector_store %arg9[%c2, %c32], %53 {strides = array<i32>} : memref<16x224xf32, #tpu.memory_space<vmem>>, vector<14x16xf32>,
    %55 = vector.extract_strided_slice %44 {offsets = [0, 0], sizes = [14, 16], strides = [1, 1]} : vector<16x16xf32> to vector<14x16xf32>
    %c2_34 = arith.constant 2 : index
    %c48 = arith.constant 48 : index
    %56 = vector.load %arg9[%c2_34, %c48] : memref<16x224xf32, #tpu.memory_space<vmem>>, vector<14x16xf32>
    tpu.vector_store %arg9[%c2_34, %c48], %55 {strides = array<i32>} : memref<16x224xf32, #tpu.memory_space<vmem>>, vector<14x16xf32>,
    %57 = vector.extract_strided_slice %43 {offsets = [0, 0], sizes = [15, 16], strides = [1, 1]} : vector<16x16xf32> to vector<15x16xf32>
    %c1 = arith.constant 1 : index
    %c64 = arith.constant 64 : index
    %58 = vector.load %arg9[%c1, %c64] : memref<16x224xf32, #tpu.memory_space<vmem>>, vector<15x16xf32>
    tpu.vector_store %arg9[%c1, %c64], %57 {strides = array<i32>} : memref<16x224xf32, #tpu.memory_space<vmem>>, vector<15x16xf32>,
    %59 = vector.extract_strided_slice %44 {offsets = [0, 0], sizes = [15, 16], strides = [1, 1]} : vector<16x16xf32> to vector<15x16xf32>
    %c1_35 = arith.constant 1 : index
    %c80 = arith.constant 80 : index
    %60 = vector.load %arg9[%c1_35, %c80] : memref<16x224xf32, #tpu.memory_space<vmem>>, vector<15x16xf32>
    tpu.vector_store %arg9[%c1_35, %c80], %59 {strides = array<i32>} : memref<16x224xf32, #tpu.memory_space<vmem>>, vector<15x16xf32>,
    %c0_36 = arith.constant 0 : index
    %c96 = arith.constant 96 : index
    %61 = vector.load %arg9[%c0_36, %c96] : memref<16x224xf32, #tpu.memory_space<vmem>>, vector<16x16xf32>
    tpu.vector_store %arg9[%c0_36, %c96], %43 {strides = array<i32>} : memref<16x224xf32, #tpu.memory_space<vmem>>, vector<16x16xf32>,
    %c0_37 = arith.constant 0 : index
    %c112 = arith.constant 112 : index
    %62 = vector.load %arg9[%c0_37, %c112] : memref<16x224xf32, #tpu.memory_space<vmem>>, vector<16x16xf32>
    tpu.vector_store %arg9[%c0_37, %c112], %44 {strides = array<i32>} : memref<16x224xf32, #tpu.memory_space<vmem>>, vector<16x16xf32>,
    %63 = vector.extract_strided_slice %43 {offsets = [1, 0], sizes = [15, 16], strides = [1, 1]} : vector<16x16xf32> to vector<15x16xf32>
    %c0_38 = arith.constant 0 : index
    %c128 = arith.constant 128 : index
    %64 = vector.load %arg9[%c0_38, %c128] : memref<16x224xf32, #tpu.memory_space<vmem>>, vector<15x16xf32>
    tpu.vector_store %arg9[%c0_38, %c128], %63 {strides = array<i32>} : memref<16x224xf32, #tpu.memory_space<vmem>>, vector<15x16xf32>,
    %65 = vector.extract_strided_slice %44 {offsets = [1, 0], sizes = [15, 16], strides = [1, 1]} : vector<16x16xf32> to vector<15x16xf32>
    %c0_39 = arith.constant 0 : index
    %c144 = arith.constant 144 : index
    %66 = vector.load %arg9[%c0_39, %c144] : memref<16x224xf32, #tpu.memory_space<vmem>>, vector<15x16xf32>
    tpu.vector_store %arg9[%c0_39, %c144], %65 {strides = array<i32>} : memref<16x224xf32, #tpu.memory_space<vmem>>, vector<15x16xf32>,
    %67 = vector.extract_strided_slice %43 {offsets = [2, 0], sizes = [14, 16], strides = [1, 1]} : vector<16x16xf32> to vector<14x16xf32>
    %c0_40 = arith.constant 0 : index
    %c160 = arith.constant 160 : index
    %68 = vector.load %arg9[%c0_40, %c160] : memref<16x224xf32, #tpu.memory_space<vmem>>, vector<14x16xf32>
    tpu.vector_store %arg9[%c0_40, %c160], %67 {strides = array<i32>} : memref<16x224xf32, #tpu.memory_space<vmem>>, vector<14x16xf32>,
    %69 = vector.extract_strided_slice %44 {offsets = [2, 0], sizes = [14, 16], strides = [1, 1]} : vector<16x16xf32> to vector<14x16xf32>
    %c0_41 = arith.constant 0 : index
    %c176 = arith.constant 176 : index
    %70 = vector.load %arg9[%c0_41, %c176] : memref<16x224xf32, #tpu.memory_space<vmem>>, vector<14x16xf32>
    tpu.vector_store %arg9[%c0_41, %c176], %69 {strides = array<i32>} : memref<16x224xf32, #tpu.memory_space<vmem>>, vector<14x16xf32>,
    %71 = vector.extract_strided_slice %43 {offsets = [3, 0], sizes = [13, 16], strides = [1, 1]} : vector<16x16xf32> to vector<13x16xf32>
    %c0_42 = arith.constant 0 : index
    %c192 = arith.constant 192 : index
    %72 = vector.load %arg9[%c0_42, %c192] : memref<16x224xf32, #tpu.memory_space<vmem>>, vector<13x16xf32>
    tpu.vector_store %arg9[%c0_42, %c192], %71 {strides = array<i32>} : memref<16x224xf32, #tpu.memory_space<vmem>>, vector<13x16xf32>,
    %73 = vector.extract_strided_slice %44 {offsets = [3, 0], sizes = [13, 16], strides = [1, 1]} : vector<16x16xf32> to vector<13x16xf32>
    %c0_43 = arith.constant 0 : index
    %c208 = arith.constant 208 : index
    %74 = vector.load %arg9[%c0_43, %c208] : memref<16x224xf32, #tpu.memory_space<vmem>>, vector<13x16xf32>
    tpu.vector_store %arg9[%c0_43, %c208], %73 {strides = array<i32>} : memref<16x224xf32, #tpu.memory_space<vmem>>, vector<13x16xf32>,
    %c0_44 = arith.constant 0 : index
    %c0_45 = arith.constant 0 : index
    %75 = vector.load %arg9[%c0_44, %c0_45] : memref<16x224xf32, #tpu.memory_space<vmem>>, vector<16x224xf32>
    %c0_46 = arith.constant 0 : index
    %c0_47 = arith.constant 0 : index
    %76 = vector.load %arg6[%c0_46, %c0_47] : memref<224x16xf32, #tpu.memory_space<vmem>>, vector<224x16xf32>
    %cst_48 = arith.constant dense<0.000000e+00> : vector<16x16xf32>
    %77 = tpu.matmul %75, %76, %cst_48 {dimension_numbers = #tpu.dot_dimension_numbers<[1], [0], [0], [1], [0, 0, 1, 1], [], []>} : vector<16x224xf32>, vector<224x16xf32>, vector<16x16xf32> -> vector<16x16xf32>
    %78 = vector.shape_cast %77 : vector<16x16xf32> to vector<1x16x16xf32>
    %c0_49 = arith.constant 0 : index
    %c0_50 = arith.constant 0 : index
    %c0_51 = arith.constant 0 : index
    %79 = vector.load %arg8[%c0_49, %c0_50, %c0_51] : memref<1x16x16xf32, #tpu.memory_space<vmem>>, vector<1x16x16xf32>
    tpu.vector_store %arg8[%c0_49, %c0_50, %c0_51], %78 {strides = array<i32>} : memref<1x16x16xf32, #tpu.memory_space<vmem>>, vector<1x16x16xf32>,
    return
  }
  func.func @transform_0(%arg0: i32) -> (i32, i32, i32, i32) {
    %c0_i32 = arith.constant 0 : i32
    %c0_i32_0 = arith.constant 0 : i32
    %c0_i32_1 = arith.constant 0 : i32
    %c0_i32_2 = arith.constant 0 : i32
    return %arg0, %c0_i32, %c0_i32_0, %c0_i32_1 : i32, i32, i32, i32
  }
  func.func @transform_1(%arg0: i32) -> (i32, i32) {
    %c0_i32 = arith.constant 0 : i32
    %c0_i32_0 = arith.constant 0 : i32
    %c0_i32_1 = arith.constant 0 : i32
    return %c0_i32, %c0_i32_0 : i32, i32
  }
  func.func @transform_2(%arg0: i32) -> (i32, i32) {
    %c0_i32 = arith.constant 0 : i32
    %c0_i32_0 = arith.constant 0 : i32
    %c0_i32_1 = arith.constant 0 : i32
    return %c0_i32, %c0_i32_0 : i32, i32
  }
  func.func @transform_3(%arg0: i32) -> (i32, i32) {
    %c0_i32 = arith.constant 0 : i32
    %c0_i32_0 = arith.constant 0 : i32
    %c0_i32_1 = arith.constant 0 : i32
    return %c0_i32, %c0_i32_0 : i32, i32
  }
  func.func @transform_4(%arg0: i32) -> (i32, i32) {
    %c0_i32 = arith.constant 0 : i32
    %c0_i32_0 = arith.constant 0 : i32
    %c0_i32_1 = arith.constant 0 : i32
    return %c0_i32, %c0_i32_0 : i32, i32
  }
  func.func @transform_5(%arg0: i32) -> (i32, i32) {
    %c0_i32 = arith.constant 0 : i32
    %c0_i32_0 = arith.constant 0 : i32
    %c0_i32_1 = arith.constant 0 : i32
    return %c0_i32, %c0_i32_0 : i32, i32
  }
  func.func @transform_6(%arg0: i32) -> (i32, i32, i32) {
    %c0_i32 = arith.constant 0 : i32
    %c0_i32_0 = arith.constant 0 : i32
    %c0_i32_1 = arith.constant 0 : i32
    return %arg0, %c0_i32, %c0_i32_0 : i32, i32, i32
  }
  func.func @transform_7(%arg0: i32) -> (i32, i32, i32) {
    %c0_i32 = arith.constant 0 : i32
    %c0_i32_0 = arith.constant 0 : i32
    %c0_i32_1 = arith.constant 0 : i32
    return %arg0, %c0_i32, %c0_i32_0 : i32, i32, i32
  }
}

module attributes {stable_mosaic.version = 11 : i64} {
  func.func @_apply_attention_kernel(%arg0: i32, %arg1: i32, %arg2: memref<1x4x256xf32, #tpu.memory_space<vmem>>, %arg3: memref<1x4x1xf32, #tpu.memory_space<vmem>>, %arg4: memref<1x1x256xf32, #tpu.memory_space<vmem>>, %arg5: memref<1x2xf32, #tpu.memory_space<vmem>>, %arg6: memref<1x4x256xf32, #tpu.memory_space<vmem>>) attributes {dimension_semantics = [#tpu.dimension_semantics<parallel>, #tpu.dimension_semantics<parallel>], iteration_bounds = array<i64: 2, 1>, scalar_prefetch = 0 : i64, scratch_operands = 0 : i64, tpu.core_type = #tpu.core_type<tc>, window_params = [{transform_indices = @transform_0, window_bounds = array<i64: 1, 4, 256>}, {transform_indices = @transform_1, window_bounds = array<i64: 1, 4, 1>}, {transform_indices = @transform_2, window_bounds = array<i64: 1, 1, 256>}, {pipeline_mode = #tpu.pipeline_mode<synchronous>, transform_indices = @transform_3, window_bounds = array<i64: 1, 2>}, {transform_indices = @transform_4, window_bounds = array<i64: 1, 4, 256>}]} {
    %c0 = arith.constant 0 : index
    %c0_0 = arith.constant 0 : index
    %0 = vector.load %arg5[%c0, %c0_0] : memref<1x2xf32, #tpu.memory_space<vmem>>, vector<1x1xf32>
    %1 = vector.shape_cast %0 : vector<1x1xf32> to vector<1x1x1xf32>
    %c0_1 = arith.constant 0 : index
    %c1 = arith.constant 1 : index
    %2 = vector.load %arg5[%c0_1, %c1] : memref<1x2xf32, #tpu.memory_space<vmem>>, vector<1x1xf32>
    %3 = vector.shape_cast %2 : vector<1x1xf32> to vector<1x1x1xf32>
    %c0_2 = arith.constant 0 : index
    %c0_3 = arith.constant 0 : index
    %c0_4 = arith.constant 0 : index
    %4 = vector.load %arg4[%c0_2, %c0_3, %c0_4] : memref<1x1x256xf32, #tpu.memory_space<vmem>>, vector<1x1x256xf32>
    %5 = vector.broadcast %1 : vector<1x1x1xf32> to vector<1x1x256xf32>
    %6 = arith.mulf %4, %5 : vector<1x1x256xf32>
    %7 = vector.broadcast %3 : vector<1x1x1xf32> to vector<1x1x256xf32>
    %8 = arith.addf %6, %7 : vector<1x1x256xf32>
    %9 = arith.negf %8 : vector<1x1x256xf32>
    %10 = math.exp %9 : vector<1x1x256xf32>
    %cst = arith.constant 1.000000e+00 : f32
    %11 = vector.broadcast %cst : f32 to vector<1x1x256xf32>
    %12 = arith.addf %11, %10 : vector<1x1x256xf32>
    %13 = arith.divf %11, %12 : vector<1x1x256xf32>
    %c0_5 = arith.constant 0 : index
    %c0_6 = arith.constant 0 : index
    %c0_7 = arith.constant 0 : index
    %14 = vector.load %arg2[%c0_5, %c0_6, %c0_7] : memref<1x4x256xf32, #tpu.memory_space<vmem>>, vector<1x4x256xf32>
    %c0_8 = arith.constant 0 : index
    %c0_9 = arith.constant 0 : index
    %c0_10 = arith.constant 0 : index
    %15 = vector.load %arg3[%c0_8, %c0_9, %c0_10] : memref<1x4x1xf32, #tpu.memory_space<vmem>>, vector<1x4x1xf32>
    %16 = vector.broadcast %15 : vector<1x4x1xf32> to vector<1x4x256xf32>
    %17 = arith.mulf %14, %16 : vector<1x4x256xf32>
    %18 = vector.broadcast %13 : vector<1x1x256xf32> to vector<1x4x256xf32>
    %19 = arith.mulf %17, %18 : vector<1x4x256xf32>
    %c0_11 = arith.constant 0 : index
    %c0_12 = arith.constant 0 : index
    %c0_13 = arith.constant 0 : index
    %20 = vector.load %arg6[%c0_11, %c0_12, %c0_13] : memref<1x4x256xf32, #tpu.memory_space<vmem>>, vector<1x4x256xf32>
    tpu.vector_store %arg6[%c0_11, %c0_12, %c0_13], %19 {strides = array<i32>} : memref<1x4x256xf32, #tpu.memory_space<vmem>>, vector<1x4x256xf32>,
    return
  }
  func.func @transform_0(%arg0: i32, %arg1: i32) -> (i32, i32, i32) {
    %c0_i32 = arith.constant 0 : i32
    %c0_i32_0 = arith.constant 0 : i32
    return %arg0, %arg1, %c0_i32 : i32, i32, i32
  }
  func.func @transform_1(%arg0: i32, %arg1: i32) -> (i32, i32, i32) {
    %c0_i32 = arith.constant 0 : i32
    %c0_i32_0 = arith.constant 0 : i32
    return %arg0, %arg1, %c0_i32 : i32, i32, i32
  }
  func.func @transform_2(%arg0: i32, %arg1: i32) -> (i32, i32, i32) {
    %c0_i32 = arith.constant 0 : i32
    %c0_i32_0 = arith.constant 0 : i32
    %c0_i32_1 = arith.constant 0 : i32
    return %arg0, %c0_i32, %c0_i32_0 : i32, i32, i32
  }
  func.func @transform_3(%arg0: i32, %arg1: i32) -> (i32, i32) {
    %c0_i32 = arith.constant 0 : i32
    %c0_i32_0 = arith.constant 0 : i32
    %c0_i32_1 = arith.constant 0 : i32
    return %c0_i32, %c0_i32_0 : i32, i32
  }
  func.func @transform_4(%arg0: i32, %arg1: i32) -> (i32, i32, i32) {
    %c0_i32 = arith.constant 0 : i32
    %c0_i32_0 = arith.constant 0 : i32
    return %arg0, %arg1, %c0_i32 : i32, i32, i32
  }
}

</mosaic_0001>

<bundles_post_ra>
// kernel: cbam_pallas.3
= control target key start
LH: loop header
LB: loop body
LE: loop exit
PB: predicated region body
PF: predicated region fallthrough
CT: control target
= control target key end

     0   :  { %s556_s15 = smov 0   ;;  %s558_s16 = smov 0   ;;  %s603_s0 = inlined_call_operand.vmem [shape: f32[2,4,256], index: 0, kind: input, shape index: {}]   ;;  %s604_s1 = inlined_call_operand.vmem [shape: f32[2,4,1], index: 1, kind: input, shape index: {}]   ;;  %s605_s2 = inlined_call_operand.vmem [shape: f32[2,1,256], index: 2, kind: input, shape index: {}]   ;;  %s606_s3 = inlined_call_operand.vmem [shape: f32[1,2], index: 3, kind: input, shape index: {}]   ;;  %s607_s4 = inlined_call_operand.vmem [shape: f32[2,4,256], index: 4, kind: output, shape index: {}]  }
   0x1   :  { %s560_s17 = smov 0  }
   0x2 LB: > { %s26_s18 = sadd.s32 1, %s522_s16  ;;  %p457_p0 = scmp.ge.s32.totalorder %s526_s17, 1  ;;  %s526_s17 = sphi %s560_s17, %s14_s17   ;;  %s522_s16 = sphi %s558_s16, %s609_s16   ;;  %s518_s15 = sphi %s556_s15, %s608_s15  }
   0x3   : > { %p28_p1 = scmp.ge.s32.totalorder %s26_s18, 2  ;;  %p205_p2 = scmp.lt.s32.totalorder %s526_s17, 3 }
   0x5   : > { %s611_s18 = smov (%p28_p1, %s26_s18), 0  ;;  %p206_p3 = pnand %p457_p0, %p205_p2 }
   0x6   : > { %p250_p4 = scmp.lt.s32.totalorder (!%p206_p3), %s518_s15, 1 }
   0x7   : > { %209 = sbr.rel (%p206_p3) target bundleno = 186 (0xba), region = 36 }
   0xc   : > { %v279_v0 = vld [vmem:[%s606_s3] sm:$0x1]  ;;  %v528_v1 = vmov 0   ;;  %s613_s15 = smov (!%p250_p4, %s518_s15), 1  ;;  %v529_v2 = vmov 1   ;;  %v286_v4 = vlaneseq }
   0xd   : > { %496 = vset.pattern.permute.xlu0 %v528_v1  ;;  %498 = vset.pattern.permute.xlu1 %v528_v1  ;;  %s460_s21 = sshll.u32 %s613_s15, 2  ;;  %s461_s25 = sshll.u32 %s613_s15, 1  ;;  %v530_v17 = vmov 839922192  }
   0xe   : > { %283 = vperm.xlu0 %496, %v279_v0   ;;  %s265_s24 = scalar_lea.vmem %s604_s1, %s460_s21  ;;  %v287_v5 = vshrl.u32 %v286_v4, 7  ;;  %s269_s28 = scalar_lea.vmem %s605_s2, %s461_s25  ;;  %v313_v18 = vunpack.c.l.s4 %v530_v17 }
   0xf   : > { %v307_v3 = vld [vmem:[%s265_s24] sm:$0xf]  ;;  %s467_s29 = sshll.u32 %s613_s15, 3 }
  0x10   : > { %310 = vperm.xlu1 %498, %v307_v3   ;;  %v288_v6 = vsub.s32 0, %v287_v5  ;;  %v280_v9 = vld [vmem:[%s269_s28] sm:$0x3]  ;;  %v314_v19 = vunpack.c.0.s8 %v313_v18  ;;  %s258_s6 = scalar_lea.vmem %s603_s0, %s467_s29  ;;  %v328_v22 = vsub.s32 1, %v287_v5  ;;  %s278_s9 = scalar_lea.vmem %s607_s4, %s467_s29 }
  0x11   : > { %v306_v24 = vld [vmem:[%s258_s6] sm:$0xff] }
  0x12   : > { %497 = vset.pattern.permute.xlu0 %v529_v2  ;;  %v317_v20 = vsub.s32 %v314_v19, %v287_v5 }
  0x13   : > { %292 = vperm.xlu0 %497, %v279_v0  }
  0x17   : > { %499 = vset.pattern.permute.xlu0 %v528_v1 }
  0x89   : > { %v284_v7 = vpop.permute.xlu0 %283 }
  0x8a   : > { %v289_v8 = vrot.slane %v284_v7, %v288_v6 }
  0x8b   : > { %v311_v21 = vpop.permute.xlu1 %310 }
  0x8c   : > { %v290_v11 = vmul.f32 %v289_v8, %v280_v9  ;;  %v318_v23 = vrot.slane %v311_v21, %v317_v20 }
  0x8e   : > { %v293_v10 = vpop.permute.xlu0 %292  ;;  %v320_v28 = vmul.f32 %v318_v23, %v306_v24 }
  0x8f   : > { %v298_v12 = vrot.slane %v293_v10, %v288_v6 }
  0x91   : > { %v299_v13 = vadd.f32 %v298_v12, %v290_v11 }
  0x93   : > { %v464_v14 = vmul.f32 -1.442695, %v299_v13 }
  0x95   : > { %500 = vpow2.f32 %v464_v14 }
  0xa2   : > { %v501_v15 = vpop.eup %500 }
  0xa3   : > { %v303_v16 = vadd.f32 1.0, %v501_v15 }
  0xa5   : > { %502 = vrcp.f32 %v303_v16 }
  0xb2   : > { %v503_v25 = vpop.eup %502 }
  0xb3   : > { %v325_v26 = vrot.slane %v503_v25, %v288_v6  ;;  %v329_v27 = vrot.slane %v503_v25, %v328_v22 }
  0xb5   : > { %v330_v29 = vcombine.low %v325_v26, %v329_v27 }
  0xb7   : > { %v332_v30 = vmul.f32 %v330_v29, %v320_v28 }
  0xb9   : > { %333 = vst [vmem:[%s278_s9] sm:$0xff] %v332_v30 }
  0xba PF: > { %s14_s17 = sadd.s32 1, %s526_s17   ;;  %s608_s15 = smov %s522_s16 }
  0xbb   : > { %p11_p5 = scmp.ge.s32.totalorder %s14_s17, 4   ;;  %s609_s16 = smov %s611_s18 }
  0xbd   :  { %13 = sbr.rel (!%p11_p5) target bundleno = 2 (0x2), region = 72 }

// kernel: cbam_pallas.2
= control target key start
LH: loop header
LB: loop body
LE: loop exit
PB: predicated region body
PF: predicated region fallthrough
CT: control target
= control target key end

     0   :  { %s1236_s24 = smov 0   ;;  %s1597_s0 = inlined_call_operand.vmem [shape: f32[2,4,16,16], index: 0, kind: input, shape index: {}]   ;;  %s1598_s1 = inlined_call_operand.vmem [shape: f32[8,4], index: 1, kind: input, shape index: {}]   ;;  %s1599_s2 = inlined_call_operand.vmem [shape: f32[8,1], index: 2, kind: input, shape index: {}]   ;;  %s1600_s3 = inlined_call_operand.vmem [shape: f32[4,8], index: 3, kind: input, shape index: {}]   ;;  %s1601_s4 = inlined_call_operand.vmem [shape: f32[4,1], index: 4, kind: input, shape index: {}]   ;;  %s1602_s5 = inlined_call_operand.vmem [shape: f32[224,16], index: 5, kind: input, shape index: {}]   ;;  %s1603_s6 = inlined_call_operand.vmem [shape: f32[2,4,1], index: 6, kind: output, shape index: {0}]   ;;  %s1604_s7 = inlined_call_operand.vmem [shape: f32[2,16,16], index: 7, kind: output, shape index: {1}]  }
   0x1 LB: > { %s1060_s25 = sadd.s32 4294967295, %s1182_s24   ;;  %p1064_p0 = scmp.ge.s32.totalorder %s1182_s24, 1  ;;  %s1182_s24 = sphi %s1236_s24, %s18_s24  }
   0x2   : > { %p240_p1 = scmp.lt.s32.totalorder %s1182_s24, 3 }
   0x4   : > { %p241_p2 = pnand %p1064_p0, %p240_p1 }
   0x5   : > { %p276_p3 = scmp.lt.s32.totalorder (!%p241_p2), %s1060_s25, 1  ;;  %s1187_s15 = smov (!%p241_p2), 127  }
   0x6   : > { %244 = sbr.rel (%p241_p2) target bundleno = 1242 (0x4da), region = 44  ;;  %s1189_s21 = smov (!%p241_p2), 48  }
   0x7   : > { %s1190_s22 = smov (!%p241_p2), 16   ;;  %s1192_s9 = smov (!%p241_p2), 96  }
   0x8   : > { %s1194_s30 = smov (!%p241_p2), 64  }
   0xb   : > { %s1606_s25 = smov (!%p276_p3, %s1060_s25), 1  ;;  %vm298_vm0 = vcmask 130048   ;;  %vm344_vm1 = vcmask 1041409   ;;  %vm346_vm2 = vcmask 1042434   ;;  %vm348_vm3 = vcmask 1043459  }
   0xc   : > { %s1078_s26 = sshll.u32 %s1606_s25, 6  ;;  %vm351_vm4 = vcmask 125952   ;;  %vm1185_vm5 = vmmov 0   ;;  %vm403_vm6 = vcmask 7168   ;;  %vm416_vm7 = vcmask 1043456   ;;  %s1067_s16 = sshll.u32 %s1606_s25, 2 }
   0xd   : > { %s280_s29 = scalar_lea.vmem %s1597_s0, %s1078_s26  ;;  %vm412_vm8 = vcmask 31744   ;;  %vm500_vm10 = vcmask 64512   ;;  %s284_s19 = scalar_lea.vmem %s1603_s6, %s1067_s16  ;;  %vm585_vm11 = vcmask 3072   ;;  %vm687_vm12 = vcmask 785413  }
   0xe   : > { %v1250_v0 = vld [vmem:[%s280_s29] sm:$0xff]  ;;  %v1252_v1 = vld [vmem:[%s280_s29 + $0x8] sm:$0xff]  ;;  %v1254_v2 = vld [vmem:[%s280_s29 + $0x10] sm:$0xff]  ;;  %vm684_vm13 = vcmask 780288   ;;  %vm697_vm14 = vcmask 130051   ;;  %vm794_vm15 = vcmask 129024  }
   0xf   : > { %v1256_v3 = vld [vmem:[%s280_s29 + $0x18] sm:$0xff]  ;;  %v1258_v4 = vld [vmem:[%s280_s29 + $0x20] sm:$0xff]  ;;  %v1260_v5 = vld [vmem:[%s280_s29 + $0x28] sm:$0xff]  ;;  %v299_v6 = vsel %vm298_vm0, %v1250_v0, 0.0  ;;  %v300_v7 = vsel %vm298_vm0, %v1252_v1, 0.0  ;;  %v308_v8 = vsel %vm298_vm0, %v1254_v2, 0.0 }
  0x10   : > { %v1268_v9 = vld [vmem:[%s280_s29 + $0x30] sm:$0xff]  ;;  %v1270_v10 = vld [vmem:[%s280_s29 + $0x38] sm:$0xff]  ;;  %v301_v11 = vadd.f32 %v300_v7, %v299_v6  ;;  %v309_v12 = vsel %vm298_vm0, %v1256_v3, 0.0  ;;  %v317_v13 = vsel %vm298_vm0, %v1258_v4, 0.0  ;;  %v318_v14 = vsel %vm298_vm0, %v1260_v5, 0.0  ;;  %s1191_s29 = smov 80  }
  0x11   : > { %v310_v15 = vadd.f32 %v309_v12, %v308_v8  ;;  %v319_v16 = vadd.f32 %v318_v14, %v317_v13  ;;  %v326_v17 = vsel %vm298_vm0, %v1268_v9, 0.0  ;;  %v327_v18 = vsel %vm298_vm0, %v1270_v10, 0.0  ;;  %s1079_s20 = sshll.u32 %s1606_s25, 4 }
  0x12   : > { %v302_v19 = vrot.slane %v301_v11, 4  ;;  %v328_v20 = vadd.f32 %v327_v18, %v326_v17  ;;  %v356_v21 = vsel %vm298_vm0, %v1250_v0, -inf  ;;  %v357_v22 = vsel %vm298_vm0, %v1252_v1, -inf  ;;  %s289_s26 = scalar_lea.vmem %s1604_s7, %s1079_s20 }
  0x13   : > { %v311_v23 = vrot.slane %v310_v15, 4  ;;  %v320_v24 = vrot.slane %v319_v16, 4  ;;  %v358_v25 = vmax.f32 %v356_v21, %v357_v22  ;;  %v365_v26 = vsel %vm298_vm0, %v1254_v2, -inf }
  0x14   : > { %v303_v27 = vadd.f32 %v302_v19, %v301_v11  ;;  %v329_v28 = vrot.slane %v328_v20, 4  ;;  %v366_v29 = vsel %vm298_vm0, %v1256_v3, -inf  ;;  %v374_v30 = vsel %vm298_vm0, %v1258_v4, -inf }
  0x15   : > { %v312_v31 = vadd.f32 %v311_v23, %v310_v15  ;;  %v321_v32 = vadd.f32 %v320_v24, %v319_v16  ;;  %v359_v33 = vrot.slane %v358_v25, 4  ;;  %v367_v34 = vmax.f32 %v365_v26, %v366_v29 }
  0x16   : > { %v304_v35 = vrot.slane %v303_v27, 2  ;;  %v330_v36 = vadd.f32 %v329_v28, %v328_v20  ;;  %v375_v37 = vsel %vm298_vm0, %v1260_v5, -inf  ;;  %v383_v38 = vsel %vm298_vm0, %v1268_v9, -inf }
  0x17   : > { %v313_v39 = vrot.slane %v312_v31, 2  ;;  %v322_v40 = vrot.slane %v321_v32, 2  ;;  %v360_v41 = vmax.f32 %v358_v25, %v359_v33  ;;  %v368_v42 = vrot.slane %v367_v34, 4 }
  0x18   : > { %v305_v43 = vadd.f32 %v304_v35, %v303_v27  ;;  %v331_v44 = vrot.slane %v330_v36, 2  ;;  %v376_v45 = vmax.f32 %v374_v30, %v375_v37  ;;  %v384_v46 = vsel %vm298_vm0, %v1270_v10, -inf  ;;  %v406_v37 = vld [vmem:[%s1599_s2] sm:$0xff] }
  0x19   : > { %v314_v47 = vadd.f32 %v313_v39, %v312_v31  ;;  %v323_v48 = vadd.f32 %v322_v40, %v321_v32  ;;  %v361_v49 = vrot.slane %v360_v41, 2  ;;  %v369_v50 = vmax.f32 %v367_v34, %v368_v42  ;;  %v494_v39 = vld [vmem:[%s1601_s4] sm:$0xf] }
  0x1a   : > { %v306_v51 = vrot.slane %v305_v43, 1  ;;  %v332_v52 = vadd.f32 %v331_v44, %v330_v36  ;;  %v377_v53 = vrot.slane %v376_v45, 4  ;;  %v385_v54 = vmax.f32 %v383_v38, %v384_v46 }
  0x1b   : > { %v315_v55 = vrot.slane %v314_v47, 1  ;;  %v324_v56 = vrot.slane %v323_v48, 1  ;;  %v362_v57 = vmax.f32 %v360_v41, %v361_v49  ;;  %v370_v58 = vrot.slane %v369_v50, 2 }
  0x1c   : > { %v307_v59 = vadd.f32 %v306_v51, %v305_v43  ;;  %v333_v60 = vrot.slane %v332_v52, 1  ;;  %v378_v61 = vmax.f32 %v376_v45, %v377_v53  ;;  %v386_v62 = vrot.slane %v385_v54, 4  ;;  %v405_v43 = vld [vmem:[%s1598_s1] sm:$0xff] }
  0x1d   : > { %v316_v63 = vadd.f32 %v315_v55, %v314_v47  ;;  %v325_v6 = vadd.f32 %v324_v56, %v323_v48  ;;  %v363_v7 = vrot.slane %v362_v57, 1  ;;  %v371_v8 = vmax.f32 %v369_v50, %v370_v58  ;;  %v493_v50 = vld [vmem:[%s1600_s3] sm:$0xf] }
  0x1e   : > { %v334_v11 = vadd.f32 %v333_v60, %v332_v52  ;;  %v336_v12 = vmul.f32 0.0625, %v307_v59  ;;  %v379_v13 = vrot.slane %v378_v61, 2  ;;  %v387_v14 = vmax.f32 %v385_v54, %v386_v62 }
  0x1f   : > { %v337_v15 = vmul.f32 0.0625, %v316_v63  ;;  %v338_v16 = vmul.f32 0.0625, %v325_v6  ;;  %v364_v17 = vmax.f32 %v362_v57, %v363_v7  ;;  %v372_v18 = vrot.slane %v371_v8, 1 }
  0x20   : > { %v339_v19 = vmul.f32 0.0625, %v334_v11  ;;  %v380_v20 = vmax.f32 %v378_v61, %v379_v13  ;;  %v388_v21 = vrot.slane %v387_v14, 2  ;;  %v1184_v36 = vmov 0.0  }
  0x21   : > { %v345_v22 = vsel %vm344_vm1, %v337_v15, %v336_v12  ;;  %v373_v23 = vmax.f32 %v371_v8, %v372_v18  ;;  %1084 = vmatprep.subr.mxu0 %v1184_v36  ;;  %683 = vst [vmem:[#allocation2] sm:$0x7] %v1184_v36  ;;  %686 = vst [vmem:[#allocation2 + $0x10] sm:$0xe0] %v1184_v36  ;;  %1089 = vmatprep.subr.mxu1 %v1184_v36  ;;  %v1186_v38 = vmov 0   ;;  %v591_v63 = vlaneseq }
  0x22   : > { %v347_v24 = vsel %vm346_vm2, %v338_v16, %v345_v22  ;;  %v381_v25 = vrot.slane %v380_v20, 1  ;;  %v389_v26 = vmax.f32 %v387_v14, %v388_v21  ;;  %1086 = vmatprep.mubr.msk.f32.mxu0 %vm1185_vm5, %v1184_v36  ;;  %1091 = vmatprep.mubr.msk.f32.mxu1 %vm1185_vm5, %v1184_v36  ;;  %v1188_v61 = vmov 1966171168   ;;  %688 = vst.msk [vmem:[#allocation2 + $0x18] sm:$0xe0] %vm687_vm12, %v1184_v36 }
  0x23   : > { %v349_v27 = vsel %vm348_vm3, %v339_v19, %v347_v24  ;;  %v396_v28 = vsel %vm344_vm1, %v373_v23, %v364_v17  ;;  %1170 = vset.pattern.permute.xlu1 %v1186_v38  ;;  %1171 = vset.pattern.permute.xlu0 %v1186_v38  ;;  %v589_v62 = vunpack.c.l.s4 %v1188_v61  ;;  %v592_v7 = vshrl.u32 %v591_v63, 7  ;;  %685 = vst.msk [vmem:[#allocation2 + $0x8] sm:$0x7] %vm684_vm13, %v1184_v36  ;;  %v877_v23 = vld [vmem:[%s1602_s5 + $0x78] sm:$0xff]  ;;  %v876_v24 = vld [vmem:[%s1602_s5 + $0x70] sm:$0xff] }
  0x24   : > { %v352_v29 = vsel %vm351_vm4, %v349_v27, 0.0  ;;  %v382_v30 = vmax.f32 %v380_v20, %v381_v25  ;;  %v390_v31 = vrot.slane %v389_v26, 1  ;;  %409 = vperm.xlu1 %1170, %v406_v37   ;;  %v875_v25 = vld [vmem:[%s1602_s5 + $0x68] sm:$0xff]  ;;  %v873_v38 = vld [vmem:[%s1602_s5 + $0x58] sm:$0xff]  ;;  %v868_v61 = vld [vmem:[%s1602_s5 + $0x30] sm:$0xff]  ;;  %vm787_vm1 = vcmask 1046528  }
  0x25   : > { %353 = vadd.xlane.f32.xlu0 %v352_v29  ;;  %v590_v6 = vunpack.c.0.s8 %v589_v62  ;;  %v614_v13 = vsub.s32 0, %v592_v7  ;;  %vm715_vm5 = vcmask 1041408   ;;  %vm752_vm12 = vcmask 654849  }
  0x26   : > { %v391_v32 = vmax.f32 %v389_v26, %v390_v31  ;;  %v397_v33 = vsel %vm346_vm2, %v382_v30, %v396_v28  ;;  %v874_v26 = vld [vmem:[%s1602_s5 + $0x60] sm:$0xff]  ;;  %vm691_vm2 = vcmask 1042432   ;;  %vm765_vm13 = vcmask 786049  }
  0x27   : > { %v593_v8 = vsub.s32 %v590_v6, %v592_v7 }
  0x28   : > { %v398_v34 = vsel %vm348_vm3, %v391_v32, %v397_v33  ;;  %497 = vperm.xlu1 %1170, %v494_v39   ;;  %vm808_vm3 = vcmask 1045504  }
  0x29   : > { %v400_v35 = vsel %vm351_vm4, %v398_v34, -inf  ;;  %vm833_vm4 = vcmask 1044480  }
  0x2a   : > { %401 = vmax.xlane.f32.xlu0 %v400_v35 }
  0x9f   : > { %v410_v45 = vpop.permute.xlu1 %409 }
  0xa3   : > { %v498_v52 = vpop.permute.xlu1 %497 }
  0xae   : > { %v354_v40 = vpop.xlane.xlu0 %353 }
  0xaf   : > { %v355_v41 = vmul.f32 0.0625, %v354_v40 }
  0xb3   : > { %v402_v42 = vpop.xlane.xlu0 %401 }
  0xb4   : > { %v404_v44 = vsel %vm403_vm6, %v355_v41, %v402_v42  ;;  %vm742_vm6 = vcmask 1040384  }
  0xb5   : > { %1085 = vmatpush3.msk.msra.mxu0 %vm416_vm7, %v404_v44  ;;  %vm711_vm7 = vcmask 261251  }
  0xb6   : > { %1087 = vmatmul.mubr.msk.f32.vlgmr.msra.gmra.mxu0 %vm412_vm8, %v405_v43  ;;  %897 = vmatprep.subr.mxu0 %v1184_v36  ;;  %vm806_vm8 = vcmask 260224  }
  0xb7   : > { %898 = vmatpush1.msra.mxu0 %v877_v23 }
  0xb8   : > { %899 = vmatprep.subr.mxu0 %v1184_v36 }
  0xb9   : > { %900 = vmatpush1.msra.mxu0 %v876_v24 }
  0xba   : > { %901 = vmatprep.subr.mxu0 %v1184_v36 }
  0xbb   : > { %902 = vmatpush1.msra.mxu0 %v875_v25 }
  0xbc   : > { %903 = vmatprep.subr.mxu0 %v1184_v36 }
  0xbd   : > { %904 = vmatpush1.msra.mxu0 %v874_v26 }
  0xbe   : > { %905 = vmatprep.subr.mxu0 %v1184_v36 }
  0xbf   : > { %906 = vmatpush1.msra.mxu0 %v873_v38 }
  0xc0   : > { %907 = vmatprep.subr.mxu0 %v1184_v36 }
 0x176   : > { %v486_v46 = vpop.f32.mrf.mxu0 }
 0x177   : > { %v487_v47 = vadd.f32 %v486_v46, %v410_v45 }
 0x178   : > { %v1088_v48 = vpop.f32.mrf.mxu0 }
 0x179   : > { %vm490_vm9 = vcmp.gt.f32.partialorder %v487_v47, 0.0  ;;  %v491_v49 = vmul.f32 0.01, %v487_v47  ;;  %v870_v48 = vld [vmem:[%s1602_s5 + $0x40] sm:$0xff] }
 0x17b   : > { %v492_v51 = vsel %vm490_vm9, %v487_v47, %v491_v49  ;;  %v871_v47 = vld [vmem:[%s1602_s5 + $0x48] sm:$0xff]  ;;  %vm713_vm9 = vcmask 261248  }
 0x17c   : > { %1090 = vmatpush3.msra.mxu1 %v492_v51 }
 0x17d   : > { %1092 = vmatmul.mubr.msk.f32.vlgmr.msra.gmra.mxu1 %vm500_vm10, %v493_v50  ;;  %1094 = vmatprep.subr.mxu1 %v1184_v36  ;;  %vm725_vm10 = vcmask 392450  }
 0x17e   : > { %1122 = vmatpush1.msra.mxu1 %v877_v23  ;;  %v864_v23 = vld [vmem:[%s1602_s5 + $0x10] sm:$0xff] }
 0x17f   : > { %1095 = vmatprep.subr.mxu1 %v1184_v36 }
 0x180   : > { %1123 = vmatpush1.msra.mxu1 %v876_v24 }
 0x181   : > { %1096 = vmatprep.subr.mxu1 %v1184_v36 }
 0x182   : > { %1124 = vmatpush1.msra.mxu1 %v875_v25 }
 0x183   : > { %1097 = vmatprep.subr.mxu1 %v1184_v36 }
 0x184   : > { %1125 = vmatpush1.msra.mxu1 %v874_v26 }
 0x185   : > { %1098 = vmatprep.subr.mxu1 %v1184_v36 }
 0x186   : > { %1126 = vmatpush1.msra.mxu1 %v873_v38  ;;  %v888_v38 = vld [vmem:[%s1602_s5 + $0xd0] sm:$0xff] }
 0x187   : > { %1099 = vmatprep.subr.mxu1 %v1184_v36 }
 0x23d   : > { %v570_v53 = vpop.f32.mrf.mxu1 }
 0x23e   : > { %v571_v54 = vadd.f32 %v570_v53, %v498_v52 }
 0x23f   : > { %v1093_v55 = vpop.f32.mrf.mxu1 }
 0x240   : > { %575 = vrot.lane.b32.xlu0 %v571_v54, %s1187_s15  ;;  %s1195_s15 = smov 112  }
 0x2b2   : > { %v576_v56 = vpop.permute.xlu0 %575 }
 0x2b3   : > { %v578_v57 = vadd.f32 %v576_v56, %v571_v54 }
 0x2b5   : > { %v1073_v58 = vmul.f32 -1.442695, %v578_v57 }
 0x2b7   : > { %1172 = vpow2.f32 %v1073_v58 }
 0x2c4   : > { %v1173_v59 = vpop.eup %1172 }
 0x2c5   : > { %v582_v60 = vadd.f32 1.0, %v1173_v59  ;;  %v869_v59 = vld [vmem:[%s1602_s5 + $0x38] sm:$0xff] }
 0x2c7   : > { %1174 = vrcp.f32 %v582_v60 }
 0x2d4   : > { %v1175_v11 = vpop.eup %1174 }
 0x2d5   : > { %586 = vst.msk [vmem:[%s284_s19] sm:$0xf] %vm585_vm11, %v1175_v11  ;;  %v594_v12 = vrot.slane %v1175_v11, %v593_v8  ;;  %vm738_vm11 = vcmask 523650  }
 0x2d7   : > { %v602_v14 = vrot.slane %v594_v12, %v593_v8  ;;  %v595_v15 = vcombine.high %v594_v12, %v594_v12  ;;  %v867_v12 = vld [vmem:[%s1602_s5 + $0x28] sm:$0xff] }
 0x2d9   : > { %v615_v16 = vrot.slane %v602_v14, %v614_v13  ;;  %v609_v17 = vrot.slane %v595_v15, %v593_v8  ;;  %v610_v19 = vcombine.high %v602_v14, %v602_v14  ;;  %v866_v15 = vld [vmem:[%s1602_s5 + $0x20] sm:$0xff] }
 0x2db   : > { %629 = vperm.xlu1 %1170, %v615_v16   ;;  %v619_v18 = vrot.slane %v609_v17, %v614_v13  ;;  %v623_v20 = vrot.slane %v610_v19, %v614_v13  ;;  %v611_v21 = vcombine.high %v609_v17, %v609_v17 }
 0x2dd   : > { %v627_v22 = vrot.slane %v611_v21, %v614_v13 }
 0x2df   : > { %633 = vperm.xlu1 %1170, %v619_v18   ;;  %v865_v18 = vld [vmem:[%s1602_s5 + $0x18] sm:$0xff] }
 0x2e3   : > { %637 = vperm.xlu1 %1170, %v623_v20  }
 0x2e7   : > { %641 = vperm.xlu1 %1170, %v627_v22  }
 0x356   : > { %v630_v27 = vpop.permute.xlu1 %629 }
 0x357   : > { %v644_v30 = vmul.f32 %v630_v27, %v1250_v0  ;;  %v645_v31 = vmul.f32 %v630_v27, %v1252_v1 }
 0x359   : > { %v652_v0 = vsel %vm298_vm0, %v644_v30, 0.0  ;;  %v659_v1 = vsel %vm298_vm0, %v645_v31, 0.0  ;;  %v676_v39 = vsel %vm298_vm0, %v645_v31, -inf  ;;  %v862_v31 = vld [vmem:[%s1602_s5] sm:$0xff] }
 0x35a   : > { %v634_v28 = vpop.permute.xlu1 %633 }
 0x35b   : > { %v646_v29 = vmul.f32 %v634_v28, %v1254_v2  ;;  %v647_v32 = vmul.f32 %v634_v28, %v1256_v3  ;;  %v872_v2 = vld [vmem:[%s1602_s5 + $0x50] sm:$0xff]  ;;  %v863_v28 = vld [vmem:[%s1602_s5 + $0x8] sm:$0xff] }
 0x35c   : > { %908 = vmatpush1.msra.mxu0 %v872_v2  ;;  %1127 = vmatpush1.msra.mxu1 %v872_v2 }
 0x35d   : > { %v653_v34 = vsel %vm298_vm0, %v646_v29, 0.0  ;;  %v660_v3 = vsel %vm298_vm0, %v647_v32, 0.0  ;;  %v670_v41 = vsel %vm298_vm0, %v646_v29, -inf  ;;  %909 = vmatprep.subr.mxu0 %v1184_v36  ;;  %v677_v50 = vsel %vm298_vm0, %v647_v32, -inf  ;;  %1100 = vmatprep.subr.mxu1 %v1184_v36 }
 0x35e   : > { %v638_v33 = vpop.permute.xlu1 %637  ;;  %v654_v40 = vadd.f32 %v653_v34, %v652_v0  ;;  %v661_v49 = vadd.f32 %v660_v3, %v659_v1  ;;  %910 = vmatpush1.msra.mxu0 %v871_v47  ;;  %1128 = vmatpush1.msra.mxu1 %v871_v47  ;;  %v887_v3 = vld [vmem:[%s1602_s5 + $0xc8] sm:$0xff] }
 0x35f   : > { %v648_v35 = vmul.f32 %v638_v33, %v1258_v4  ;;  %v649_v37 = vmul.f32 %v638_v33, %v1260_v5  ;;  %v669_v5 = vsel %vm298_vm0, %v644_v30, -inf  ;;  %911 = vmatprep.subr.mxu0 %v1184_v36  ;;  %1101 = vmatprep.subr.mxu1 %v1184_v36  ;;  %v889_v33 = vld [vmem:[%s1602_s5 + $0xd8] sm:$0xff]  ;;  %v883_v47 = vld [vmem:[%s1602_s5 + $0xa8] sm:$0xff] }
 0x360   : > { %912 = vmatpush1.msra.mxu0 %v870_v48  ;;  %1129 = vmatpush1.msra.mxu1 %v870_v48 }
 0x361   : > { %v655_v4 = vsel %vm298_vm0, %v648_v35, 0.0  ;;  %v662_v43 = vsel %vm298_vm0, %v649_v37, 0.0  ;;  %v671_v44 = vsel %vm298_vm0, %v648_v35, -inf  ;;  %v678_v52 = vsel %vm298_vm0, %v649_v37, -inf  ;;  %913 = vmatprep.subr.mxu0 %v1184_v36  ;;  %1102 = vmatprep.subr.mxu1 %v1184_v36 }
 0x362   : > { %v642_v42 = vpop.permute.xlu1 %641  ;;  %v656_v51 = vadd.f32 %v655_v4, %v654_v40  ;;  %v663_v55 = vadd.f32 %v662_v43, %v661_v49  ;;  %v672_v56 = vmax.f32 %v669_v5, %v671_v44  ;;  %v679_v60 = vmax.f32 %v676_v39, %v678_v52  ;;  %914 = vmatpush1.msra.mxu0 %v869_v59  ;;  %v886_v5 = vld [vmem:[%s1602_s5 + $0xc0] sm:$0xff] }
 0x363   : > { %v650_v45 = vmul.f32 %v642_v42, %v1268_v9  ;;  %v651_v46 = vmul.f32 %v642_v42, %v1270_v10  ;;  %915 = vmatprep.subr.mxu0 %v1184_v36  ;;  %1130 = vmatpush1.msra.mxu1 %v869_v59 }
 0x364   : > { %916 = vmatpush1.msra.mxu0 %v868_v61  ;;  %1103 = vmatprep.subr.mxu1 %v1184_v36 }
 0x365   : > { %v657_v9 = vsel %vm298_vm0, %v650_v45, 0.0  ;;  %v664_v10 = vsel %vm298_vm0, %v651_v46, 0.0  ;;  %v673_v53 = vsel %vm298_vm0, %v650_v45, -inf  ;;  %v680_v54 = vsel %vm298_vm0, %v651_v46, -inf  ;;  %917 = vmatprep.subr.mxu0 %v1184_v36  ;;  %1131 = vmatpush1.msra.mxu1 %v868_v61  ;;  %v884_v46 = vld [vmem:[%s1602_s5 + $0xb0] sm:$0xff] }
 0x366   : > { %v674_v57 = vmax.f32 %v670_v41, %v673_v53  ;;  %v681_v58 = vmax.f32 %v677_v50, %v680_v54  ;;  %v658_v62 = vadd.f32 %v657_v9, %v656_v51  ;;  %v665_v63 = vadd.f32 %v664_v10, %v663_v55  ;;  %918 = vmatpush1.msra.mxu0 %v867_v12  ;;  %v885_v41 = vld [vmem:[%s1602_s5 + $0xb8] sm:$0xff]  ;;  %v882_v51 = vld [vmem:[%s1602_s5 + $0xa0] sm:$0xff]  ;;  %v880_v53 = vld [vmem:[%s1602_s5 + $0x90] sm:$0xff] }
 0x367   : > { %919 = vmatprep.subr.mxu0 %v1184_v36  ;;  %1104 = vmatprep.subr.mxu1 %v1184_v36  ;;  %v881_v10 = vld [vmem:[%s1602_s5 + $0x98] sm:$0xff] }
 0x368   : > { %v1399_v6 = vmax.f32 %v672_v56, %v674_v57  ;;  %v1403_v7 = vmax.f32 %v679_v60, %v681_v58  ;;  %v1412_v13 = vmul.f32 0.25, %v658_v62  ;;  %v1414_v14 = vmul.f32 0.25, %v665_v63  ;;  %920 = vmatpush1.msra.mxu0 %v866_v15  ;;  %1132 = vmatpush1.msra.mxu1 %v867_v12  ;;  %v879_v56 = vld [vmem:[%s1602_s5 + $0x88] sm:$0xff]  ;;  %v878_v57 = vld [vmem:[%s1602_s5 + $0x80] sm:$0xff] }
 0x369   : > { %921 = vmatprep.subr.mxu0 %v1184_v36  ;;  %1105 = vmatprep.subr.mxu1 %v1184_v36 }
 0x36a   : > { %v729_v8 = vrot.slane %v1399_v6, 6  ;;  %v702_v11 = vrot.slane %v1399_v6, 5  ;;  %v756_v16 = vrot.slane %v1399_v6, 7  ;;  %v797_v17 = vrot.slane %v1403_v7, 1  ;;  %922 = vmatpush1.msra.mxu0 %v865_v18  ;;  %1133 = vmatpush1.msra.mxu1 %v866_v15 }
 0x36b   : > { %v692_v19 = vrot.slane %v1412_v13, 5  ;;  %v789_v20 = vrot.slane %v1414_v14, 1  ;;  %v788_v21 = vrot.slane %v1412_v13, 1  ;;  %v822_v22 = vrot.slane %v1403_v7, 2  ;;  %923 = vmatprep.subr.mxu0 %v1184_v36  ;;  %1106 = vmatprep.subr.mxu1 %v1184_v36 }
 0x36c   : > { %732 = vrot.lane.b32.xlu0 %v729_v8, %s1189_s21  ;;  %705 = vrot.lane.b32.xlu1 %v702_v11, %s1190_s22  ;;  %v693_v24 = vrot.slane %v1414_v14, 5  ;;  %v796_v25 = vrot.slane %v1399_v6, 1  ;;  %v821_v30 = vrot.slane %v1399_v6, 2  ;;  %v847_v32 = vrot.slane %v1403_v7, 3 }
 0x36d   : > { %698 = vst.msk [vmem:[#allocation2] sm:$0xf8] %vm697_vm14, %v692_v19  ;;  %v790_v26 = vsel %vm787_vm1, %v788_v21, %v789_v20  ;;  %924 = vmatpush1.msra.mxu0 %v864_v23  ;;  %1134 = vmatpush1.msra.mxu1 %v865_v18  ;;  %v703_v35 = vrot.slane %v1403_v7, 5  ;;  %v846_v37 = vrot.slane %v1399_v6, 3  ;;  %v730_v1 = vrot.slane %v1403_v7, 6 }
 0x36e   : > { %795 = vst.msk [vmem:[#allocation2 + $0x18] sm:$0x7f] %vm794_vm15, %v789_v20  ;;  %v694_v27 = vsel %vm691_vm2, %v692_v19, %v693_v24  ;;  %925 = vmatprep.subr.mxu0 %v1184_v36  ;;  %1107 = vmatprep.subr.mxu1 %v1184_v36  ;;  %v798_v29 = vsel %vm787_vm1, %v796_v25, %v797_v17  ;;  %v716_v4 = vrot.slane %v1412_v13, 6  ;;  %v757_v40 = vrot.slane %v1403_v7, 7 }
 0x36f   : > { %793 = vst.msk [vmem:[#allocation2 + $0x8] sm:$0xff] %vm298_vm0, %v790_v26  ;;  %699 = vst.msk [vmem:[#allocation2 + $0x10] sm:$0xff] %vm298_vm0, %v694_v27  ;;  %926 = vmatpush1.msra.mxu0 %v863_v28  ;;  %1135 = vmatpush1.msra.mxu1 %v864_v23  ;;  %v823_v34 = vsel %vm808_vm3, %v821_v30, %v822_v22  ;;  %v704_v2 = vsel %vm691_vm2, %v702_v11, %v703_v35  ;;  %v743_v42 = vrot.slane %v1412_v13, 7  ;;  %vm775_vm14 = vcmask 917248  }
 0x370   : > { %759 = vrot.lane.b32.xlu0 %v756_v16, %s1191_s29  ;;  %801 = vrot.lane.b32.xlu1 %v797_v17, %s1190_s22  ;;  %v848_v0 = vsel %vm833_vm4, %v846_v37, %v847_v32  ;;  %v731_v39 = vsel %vm715_vm5, %v729_v8, %v730_v1  ;;  %v758_v43 = vsel %vm742_vm6, %v756_v16, %v757_v40  ;;  %v810_v44 = vrot.slane %v1414_v14, 2 }
 0x371   : > { %927 = vmatprep.subr.mxu0 %v1184_v36  ;;  %1108 = vmatprep.subr.mxu1 %v1184_v36  ;;  %v809_v45 = vrot.slane %v1412_v13, 2  ;;  %v835_v49 = vrot.slane %v1414_v14, 3  ;;  %v834_v50 = vrot.slane %v1412_v13, 3  ;;  %v717_v9 = vrot.slane %v1414_v14, 6 }
 0x372   : > { %928 = vmatpush1.msra.mxu0 %v862_v31  ;;  %1136 = vmatpush1.msra.mxu1 %v863_v28  ;;  %v744_v55 = vrot.slane %v1414_v14, 7  ;;  %vm819_vm15 = vcmask 390400   ;;  %vm727_vm1 = vcmask 392448   ;;  %vm831_vm2 = vcmask 521600  }
 0x373   : > { %937 = vmatprep.subr.mxu0 %v1184_v36  ;;  %1109 = vmatprep.subr.mxu1 %v1184_v36  ;;  %v811_v48 = vsel %vm808_vm3, %v809_v45, %v810_v44  ;;  %v836_v52 = vsel %vm833_vm4, %v834_v50, %v835_v49  ;;  %v718_v54 = vsel %vm715_vm5, %v716_v4, %v717_v9  ;;  %vm740_vm3 = vcmask 523648  }
 0x374   : > { %826 = vrot.lane.b32.xlu1 %v822_v22, %s1189_s21  ;;  %769 = vrot.lane.b32.xlu0 %v1412_v13, %s1192_s9  ;;  %v745_v58 = vsel %vm742_vm6, %v743_v42, %v744_v55  ;;  %vm844_vm4 = vcmask 651776   ;;  %vm754_vm5 = vcmask 654848   ;;  %vm856_vm6 = vcmask 782976  }
 0x375   : > { %938 = vmatpush2.msra.mxu0 %v889_v33  ;;  %1137 = vmatpush1.msra.mxu1 %v862_v31 }
 0x376   : > { %939 = vmatprep.subr.mxu0 %v1184_v36  ;;  %1110 = vmatprep.subr.mxu1 %v1184_v36 }
 0x377   : > { %940 = vmatpush2.msra.mxu0 %v888_v38  ;;  %1138 = vmatpush2.msra.mxu1 %v889_v33 }
 0x378   : > { %771 = vrot.lane.b32.xlu1 %v1414_v14, %s1192_s9  ;;  %799 = vrot.lane.b32.xlu0 %v798_v29, %s1190_s22 }
 0x379   : > { %941 = vmatprep.subr.mxu0 %v1184_v36  ;;  %1111 = vmatprep.subr.mxu1 %v1184_v36 }
 0x37a   : > { %942 = vmatpush2.msra.mxu0 %v887_v3  ;;  %1139 = vmatpush2.msra.mxu1 %v888_v38 }
 0x37b   : > { %943 = vmatprep.subr.mxu0 %v1184_v36  ;;  %1112 = vmatprep.subr.mxu1 %v1184_v36 }
 0x37c   : > { %851 = vrot.lane.b32.xlu1 %v847_v32, %s1191_s29  ;;  %824 = vrot.lane.b32.xlu0 %v823_v34, %s1189_s21 }
 0x37d   : > { %944 = vmatpush2.msra.mxu0 %v886_v5  ;;  %1140 = vmatpush2.msra.mxu1 %v887_v3 }
 0x37e   : > { %945 = vmatprep.subr.mxu0 %v1184_v36  ;;  %1113 = vmatprep.subr.mxu1 %v1184_v36 }
 0x37f   : > { %946 = vmatpush2.msra.mxu0 %v885_v41  ;;  %1141 = vmatpush2.msra.mxu1 %v886_v5 }
 0x380   : > { %707 = vrot.lane.b32.xlu1 %v704_v2, %s1190_s22  ;;  %849 = vrot.lane.b32.xlu0 %v848_v0, %s1191_s29  ;;  %s1193_s22 = smov 32  }
 0x381   : > { %947 = vmatprep.subr.mxu0 %v1184_v36  ;;  %1114 = vmatprep.subr.mxu1 %v1184_v36 }
 0x382   : > { %948 = vmatpush2.msra.mxu0 %v884_v46  ;;  %1142 = vmatpush2.msra.mxu1 %v885_v41 }
 0x383   : > { %949 = vmatprep.subr.mxu0 %v1184_v36  ;;  %1115 = vmatprep.subr.mxu1 %v1184_v36 }
 0x384   : > { %734 = vrot.lane.b32.xlu1 %v731_v39, %s1189_s21  ;;  %719 = vrot.lane.b32.xlu0 %v716_v4, %s1193_s22 }
 0x385   : > { %950 = vmatpush2.msra.mxu0 %v883_v47  ;;  %1143 = vmatpush2.msra.mxu1 %v884_v46 }
 0x386   : > { %951 = vmatprep.subr.mxu0 %v1184_v36  ;;  %1116 = vmatprep.subr.mxu1 %v1184_v36 }
 0x387   : > { %952 = vmatpush2.msra.mxu0 %v882_v51  ;;  %1144 = vmatpush2.msra.mxu1 %v883_v47 }
 0x388   : > { %761 = vrot.lane.b32.xlu1 %v758_v43, %s1191_s29  ;;  %746 = vrot.lane.b32.xlu0 %v743_v42, %s1194_s30 }
 0x389   : > { %953 = vmatprep.subr.mxu0 %v1184_v36  ;;  %1117 = vmatprep.subr.mxu1 %v1184_v36 }
 0x38a   : > { %954 = vmatpush2.msra.mxu0 %v881_v10  ;;  %1145 = vmatpush2.msra.mxu1 %v882_v51 }
 0x38b   : > { %955 = vmatprep.subr.mxu0 %v1184_v36  ;;  %1118 = vmatprep.subr.mxu1 %v1184_v36 }
 0x38c   : > { %814 = vrot.lane.b32.xlu1 %v810_v44, %s1193_s22  ;;  %812 = vrot.lane.b32.xlu0 %v811_v48, %s1193_s22 }
 0x38d   : > { %956 = vmatpush2.msra.mxu0 %v880_v53  ;;  %1146 = vmatpush2.msra.mxu1 %v881_v10 }
 0x38e   : > { %957 = vmatprep.subr.mxu0 %v1184_v36  ;;  %1119 = vmatprep.subr.mxu1 %v1184_v36 }
 0x38f   : > { %958 = vmatpush2.msra.mxu0 %v879_v56  ;;  %1147 = vmatpush2.msra.mxu1 %v880_v53 }
 0x390   : > { %839 = vrot.lane.b32.xlu1 %v835_v49, %s1194_s30  ;;  %837 = vrot.lane.b32.xlu0 %v836_v52, %s1194_s30 }
 0x391   : > { %959 = vmatprep.subr.mxu0 %v1184_v36  ;;  %1120 = vmatprep.subr.mxu1 %v1184_v36 }
 0x392   : > { %960 = vmatpush2.msra.mxu0 %v878_v57  ;;  %1148 = vmatpush2.msra.mxu1 %v879_v56 }
 0x393   : > { %1121 = vmatprep.subr.mxu1 %v1184_v36 }
 0x394   : > { %778 = vrot.lane.b32.xlu0 %v1399_v6, %s1195_s15  ;;  %721 = vrot.lane.b32.xlu1 %v718_v54, %s1193_s22 }
 0x395   : > { %1149 = vmatpush2.msra.mxu1 %v878_v57 }
 0x398   : > { %748 = vrot.lane.b32.xlu1 %v745_v58, %s1194_s30 }
 0x39c   : > { %780 = vrot.lane.b32.xlu1 %v1403_v7, %s1195_s15 }
 0x3de   : > { %v733_v59 = vpop.permute.xlu0 %732  ;;  %v706_v60 = vpop.permute.xlu1 %705 }
 0x3df   : > { %712 = vst.msk [vmem:[#allocation2] sm:$0xf8] %vm711_vm7, %v706_v60  ;;  %vm767_vm7 = vcmask 786048  }
 0x3e2   : > { %v760_v61 = vpop.permute.xlu0 %759  ;;  %v802_v62 = vpop.permute.xlu1 %801 }
 0x3e3   : > { %807 = vst.msk [vmem:[#allocation2 + $0x18] sm:$0x7f] %vm806_vm8, %v802_v62  ;;  %vm784_vm8 = vcmask 1048448  }
 0x3e6   : > { %v827_v63 = vpop.permute.xlu1 %826  ;;  %v770_v6 = vpop.permute.xlu0 %769 }
 0x3ea   : > { %v772_v8 = vpop.permute.xlu1 %771  ;;  %v800_v11 = vpop.permute.xlu0 %799 }
 0x3eb   : > { %805 = vst.msk [vmem:[#allocation2 + $0x8] sm:$0xff] %vm713_vm9, %v800_v11 }
 0x3ee   : > { %v852_v12 = vpop.permute.xlu1 %851  ;;  %v825_v13 = vpop.permute.xlu0 %824 }
 0x3f2   : > { %v708_v36 = vpop.permute.xlu1 %707  ;;  %v850_v14 = vpop.permute.xlu0 %849 }
 0x3f3   : > { %714 = vst.msk [vmem:[#allocation2 + $0x10] sm:$0xff] %vm713_vm9, %v708_v36  ;;  %vm890_vm9 = vcmask 785408  }
 0x3f6   : > { %v735_v7 = vpop.permute.xlu1 %734  ;;  %v720_v15 = vpop.permute.xlu0 %719 }
 0x3f7   : > { %726 = vst.msk [vmem:[#allocation2] sm:$0xfc] %vm725_vm10, %v720_v15 }
 0x3f8   : > { %739 = vst.msk [vmem:[#allocation2] sm:$0xfc] %vm738_vm11, %v733_v59 }
 0x3fa   : > { %v762_v16 = vpop.permute.xlu1 %761  ;;  %v747_v17 = vpop.permute.xlu0 %746 }
 0x3fb   : > { %753 = vst.msk [vmem:[#allocation2] sm:$0xfe] %vm752_vm12, %v747_v17 }
 0x3fc   : > { %766 = vst.msk [vmem:[#allocation2] sm:$0xfe] %vm765_vm13, %v760_v61 }
 0x3fd   : > { %776 = vst.msk [vmem:[#allocation2] sm:$0xff] %vm775_vm14, %v770_v6 }
 0x3fe   : > { %v815_v18 = vpop.permute.xlu1 %814  ;;  %v813_v19 = vpop.permute.xlu0 %812 }
 0x3ff   : > { %820 = vst.msk [vmem:[#allocation2 + $0x18] sm:$0x3f] %vm819_vm15, %v815_v18 }
 0x400   : > { %818 = vst.msk [vmem:[#allocation2 + $0x8] sm:$0xff] %vm727_vm1, %v813_v19 }
 0x401   : > { %832 = vst.msk [vmem:[#allocation2 + $0x18] sm:$0x3f] %vm831_vm2, %v827_v63 }
 0x402   : > { %830 = vst.msk [vmem:[#allocation2 + $0x8] sm:$0xff] %vm740_vm3, %v825_v13  ;;  %v840_v20 = vpop.permute.xlu1 %839  ;;  %v838_v21 = vpop.permute.xlu0 %837 }
 0x403   : > { %845 = vst.msk [vmem:[#allocation2 + $0x18] sm:$0x1f] %vm844_vm4, %v840_v20 }
 0x404   : > { %843 = vst.msk [vmem:[#allocation2 + $0x8] sm:$0xff] %vm754_vm5, %v838_v21 }
 0x405   : > { %857 = vst.msk [vmem:[#allocation2 + $0x18] sm:$0x1f] %vm856_vm6, %v852_v12 }
 0x406   : > { %855 = vst.msk [vmem:[#allocation2 + $0x8] sm:$0xff] %vm767_vm7, %v850_v14  ;;  %v779_v22 = vpop.permute.xlu0 %778  ;;  %v722_v23 = vpop.permute.xlu1 %721 }
 0x407   : > { %785 = vst.msk [vmem:[#allocation2] sm:$0xff] %vm784_vm8, %v779_v22 }
 0x408   : > { %728 = vst.msk [vmem:[#allocation2 + $0x10] sm:$0xff] %vm727_vm1, %v722_v23 }
 0x409   : > { %741 = vst.msk [vmem:[#allocation2 + $0x10] sm:$0xff] %vm740_vm3, %v735_v7 }
 0x40a   : > { %v749_v24 = vpop.permute.xlu1 %748 }
 0x40b   : > { %755 = vst.msk [vmem:[#allocation2 + $0x10] sm:$0xff] %vm754_vm5, %v749_v24 }
 0x40c   : > { %v861_v26 = vld [vmem:[#allocation2 + $0x18] sm:$0xff]  ;;  %768 = vst.msk [vmem:[#allocation2 + $0x10] sm:$0xff] %vm767_vm7, %v762_v16 }
 0x40d   : > { %v859_v25 = vld [vmem:[#allocation2 + $0x8] sm:$0xff]  ;;  %1075 = vmatprep.mubr.msk.f32.mxu1 %vm890_vm9, %v861_v26  ;;  %777 = vst.msk [vmem:[#allocation2 + $0x10] sm:$0xff] %vm775_vm14, %v772_v8 }
 0x40e   : > { %1074 = vmatprep.mubr.msk.f32.mxu0 %vm890_vm9, %v859_v25  ;;  %v781_v27 = vpop.permute.xlu1 %780  ;;  %v858_v28 = vld [vmem:[#allocation2] sm:$0xff] }
 0x40f   : > { %786 = vst.msk [vmem:[#allocation2 + $0x10] sm:$0xff] %vm784_vm8, %v781_v27  ;;  %962 = vmatmul.mubr.f32.vlgmr.msra.gmra.mxu0 %v858_v28 }
 0x416   : > { %v860_v29 = vld [vmem:[#allocation2 + $0x10] sm:$0xff] }
 0x417   : > { %967 = vmatmul.mubr.f32.vlgmr.msra.gmra.mxu1 %v860_v29 }
 0x4cf   : > { %v963_v30 = vpop.f32.mrf.mxu0 }
 0x4d0   : > { %972 = vst.msk [vmem:[%s289_s26] sm:$0xff] %vm298_vm0, %v963_v30 }
 0x4d1   : > { %v965_v31 = vpop.f32.mrf.mxu0 }
 0x4d7   : > { %v968_v32 = vpop.f32.mrf.mxu1 }
 0x4d8   : > { %973 = vst.msk [vmem:[%s289_s26 + $0x8] sm:$0xff] %vm298_vm0, %v968_v32 }
 0x4d9   : > { %v970_v33 = vpop.f32.mrf.mxu1 }
 0x4da PF: > { %s18_s24 = sadd.s32 1, %s1182_s24  }
 0x4db   : > { %p15_p4 = scmp.ge.s32.totalorder %s18_s24, 4  }
 0x4dd   :  { %17 = sbr.rel (!%p15_p4) target bundleno = 1 (0x1), region = 86 }

</bundles_post_ra>
